<compile_context>
chip_gen: v5e
topology: v5e:2x2
jax: 0.10.0
libtpu: 0.0.40
codegen_flags: <defaults>
</compile_context>

<pallas_src>
import functools

import jax
import jax.numpy as jnp
from jax.experimental import pallas as pl
from jax.experimental.pallas import tpu as pltpu

_LANE = 128


def _dice_partial_kernel(x_ref, t_ref, acc_ref, *, m_total, tm, mi_steps):
    """Accumulate per-lane softmax-probability-at-target-class partial sums.

    x_ref:   (1, C, TM) logits tile (native dtype; bf16 stays bf16 on v6e/v7x).
    t_ref:   (1, 1, TM) int32 labels tile.
    acc_ref: (1, 1, 1, TM) f32 per-lane intersection accumulator, resident
             across the inner spatial grid axis for the current (b, m_outer).
    """
    mo = pl.program_id(1)
    mi = pl.program_id(2)

    @pl.when(mi == 0)
    def _():
        acc_ref[...] = jnp.zeros_like(acc_ref)

    x = x_ref[0]                                    # (C, TM) logits
    t = t_ref[0]                                    # (1, TM) int32 labels

    # Gather the target-class logit per lane via iota compare + sublane sum.
    cls = jax.lax.broadcasted_iota(jnp.int32, x.shape, 0)          # (C, TM)
    x_t = jnp.sum(jnp.where(cls == t, x, jnp.zeros_like(x)),
                  axis=0, keepdims=True)                           # (1, TM)

    # p_t = softmax(x)[t] = 1 / sum_c exp(x_c - x_t).
    # (Overflow of exp -> +inf -> p_t = 0, the correct limit.)
    ex = jnp.exp(x - x_t)                                          # (C, TM)
    denom = jnp.sum(ex, axis=0, keepdims=True).astype(jnp.float32)  # (1, TM)
    p_t = pl.reciprocal(denom, approx=False)                       # (1, TM) f32

    # Mask lanes past the true spatial extent (replaces wrapper-side padding;
    # garbage in the padded tail of a partial block is discarded here).
    lane = jax.lax.broadcasted_iota(jnp.int32, p_t.shape, 1)       # (1, TM)
    start = (mo * mi_steps + mi) * tm
    valid = (start + lane) < m_total

    contrib = jnp.where(valid, p_t, jnp.float32(0.0))              # (1, TM)
    acc_ref[...] = acc_ref[...] + contrib.reshape(acc_ref.shape)


def dice_loss_3d_pallas(logits: jax.Array, target: jax.Array, eps: float = 1e-8) -> jax.Array:
    """logits: (B, C, S, H, W) float; target: (B, S, H, W) int in [0, C)."""
    B, C, S, H, W = logits.shape
    M = S * H * W

    x = logits.reshape(B, C, M)
    if x.dtype not in (jnp.float32, jnp.bfloat16):
        x = x.astype(jnp.float32)
    t = target.reshape(B, 1, M).astype(jnp.int32)

    x_bytes = jnp.dtype(x.dtype).itemsize

    # --- Spatial tile TM (multiple of 128):
    #   * bounded by a modest VMEM budget (double-buffered inputs + resident acc),
    #   * capped at 32K lanes,
    #   * small enough to give ~8 pipeline steps per batch element,
    #   * never larger than the lane-rounded spatial extent.
    vmem_budget = 10 * 1024 * 1024
    per_lane = 2 * (C * x_bytes + 4) + 4            # 2x(inputs) + resident f32 acc
    tm_budget = max(_LANE, (vmem_budget // per_lane) // _LANE * _LANE)
    tm_steps = pl.cdiv(pl.cdiv(M, 8), _LANE) * _LANE
    TM = min(min(tm_budget, 32 * 1024),
             max(4 * _LANE, tm_steps),
             pl.cdiv(M, _LANE) * _LANE)

    n_blocks = pl.cdiv(M, TM)
    # Split the spatial axis into (parallel outer, arbitrary inner) so v7x's two
    # TensorCores stay busy even when B == 1.  Only used when it divides evenly,
    # so no fully-out-of-bounds blocks are ever generated.  No-op on v5e/v6e.
    MO = 2 if (n_blocks >= 4 and n_blocks % 2 == 0) else 1
    MI = n_blocks // MO
    grid = (B, MO, MI)

    kernel = functools.partial(_dice_partial_kernel, m_total=M, tm=TM, mi_steps=MI)

    cost = pl.CostEstimate(
        flops=int(5 * B * C * M),
        transcendentals=int(B * C * M),
        bytes_accessed=int(B * M * (C * x_bytes + 4) + B * MO * TM * 4),
    )

    # NOTE: for very small C one could additionally fold spare sublanes with the
    # spatial axis (reshape to (B, 8, C*M/8) + strided segmented sublane reduce);
    # not implemented here — per-class sublane padding is accepted.
    partial = pl.pallas_call(
        kernel,
        out_shape=jax.ShapeDtypeStruct((B, MO, 1, TM), jnp.float32),
        grid_spec=pltpu.PrefetchScalarGridSpec(
            num_scalar_prefetch=0,
            grid=grid,
            in_specs=[
                pl.BlockSpec((1, C, TM), lambda b, mo, mi: (b, 0, mo * MI + mi)),
                pl.BlockSpec((1, 1, TM), lambda b, mo, mi: (b, 0, mo * MI + mi)),
            ],
            out_specs=pl.BlockSpec((1, 1, 1, TM), lambda b, mo, mi: (b, mo, 0, 0)),
        ),
        compiler_params=pltpu.CompilerParams(
            dimension_semantics=("parallel", "parallel", "arbitrary"),
        ),
        cost_estimate=cost,
    )(x, t)

    # Intersection per batch element; cardinality is analytically 2*M because
    # the class softmax sums to 1 per voxel and the one-hot target sums to 1.
    inter = jnp.sum(partial, axis=(1, 2, 3))                     # (B,)
    card = jnp.float32(2.0 * M)
    dice = 2.0 * inter / (card + jnp.float32(eps))
    return jnp.mean(1.0 - dice)


def _dice_loss_3d_ref(logits, target, eps=1e-8):
    p = jax.nn.softmax(logits.astype(jnp.float32), axis=1)
    onehot = jax.nn.one_hot(target, logits.shape[1], dtype=jnp.float32)
    onehot = jnp.moveaxis(onehot, -1, 1)          # (B, C, S, H, W)
    dims = (1, 2, 3, 4)
    inter = jnp.sum(p * onehot, axis=dims)
    card = jnp.sum(p + onehot, axis=dims)
    dice = 2.0 * inter / (card + eps)
    return jnp.mean(-dice + 1.0)


if __name__ == "__main__":
    key = jax.random.PRNGKey(0)
    k1, k2, k3, k4 = jax.random.split(key, 4)

    # Main check: spatial size a multiple of the tile (exercises both grid
    # parallel axes and the multi-step inner reduction).
    B, C, S, H, W = 2, 4, 8, 16, 16
    logits = jax.random.normal(k1, (B, C, S, H, W), dtype=jnp.float32)
    target = jax.random.randint(k2, (B, S, H, W), 0, C, dtype=jnp.int32)

    loss = jax.block_until_ready(dice_loss_3d_pallas(logits, target))
    ref = _dice_loss_3d_ref(logits, target)
    assert jnp.allclose(loss, ref, rtol=1e-5, atol=1e-6), (loss, ref)

    # Second check: ragged spatial size exercising the in-kernel lane masking
    # (partial final block, no wrapper-side padding).
    B2, C2, S2, H2, W2 = 2, 4, 3, 5, 7
    logits2 = jax.random.normal(k3, (B2, C2, S2, H2, W2), dtype=jnp.float32)
    target2 = jax.random.randint(k4, (B2, S2, H2, W2), 0, C2, dtype=jnp.int32)

    loss2 = jax.block_until_ready(dice_loss_3d_pallas(logits2, target2))
    ref2 = _dice_loss_3d_ref(logits2, target2)
    assert jnp.allclose(loss2, ref2, rtol=1e-5, atol=1e-6), (loss2, ref2)

    print("KERNEL_OK")
</pallas_src>

<mosaic_0001>
module attributes {stable_mosaic.version = 11 : i64} {
  func.func @_dice_partial_kernel(%arg0: i32, %arg1: i32, %arg2: i32, %arg3: memref<1x4x512xf32, #tpu.memory_space<vmem>>, %arg4: memref<1x1x512xi32, #tpu.memory_space<vmem>>, %arg5: memref<1x1x1x512xf32, #tpu.memory_space<vmem>>) attributes {dimension_semantics = [#tpu.dimension_semantics<parallel>, #tpu.dimension_semantics<parallel>, #tpu.dimension_semantics<arbitrary>], iteration_bounds = array<i64: 2, 2, 2>, scalar_prefetch = 0 : i64, scratch_operands = 0 : i64, tpu.core_type = #tpu.core_type<tc>, window_params = [{transform_indices = @transform_0, window_bounds = array<i64: 1, 4, 512>}, {transform_indices = @transform_1, window_bounds = array<i64: 1, 1, 512>}, {transform_indices = @transform_2, window_bounds = array<i64: 1, 1, 1, 512>}]} {
    %c0_i32 = arith.constant 0 : i32
    %0 = arith.cmpi eq, %arg2, %c0_i32 : i32
    %1 = arith.extui %0 : i1 to i32
    %c0_i32_0 = arith.constant 0 : i32
    %2 = arith.cmpi ne, %1, %c0_i32_0 : i32
    scf.if %2 {
      %cst_17 = arith.constant 0.000000e+00 : f32
      %34 = vector.broadcast %cst_17 : f32 to vector<1x1x1x512xf32>
      %c0_18 = arith.constant 0 : index
      %c0_19 = arith.constant 0 : index
      %c0_20 = arith.constant 0 : index
      %c0_21 = arith.constant 0 : index
      %35 = vector.load %arg5[%c0_18, %c0_19, %c0_20, %c0_21] : memref<1x1x1x512xf32, #tpu.memory_space<vmem>>, vector<1x1x1x512xf32>
      tpu.vector_store %arg5[%c0_18, %c0_19, %c0_20, %c0_21], %34 {strides = array<i32>} : memref<1x1x1x512xf32, #tpu.memory_space<vmem>>, vector<1x1x1x512xf32>,
    } else {
    }
    %c0 = arith.constant 0 : index
    %c0_1 = arith.constant 0 : index
    %c0_2 = arith.constant 0 : index
    %3 = vector.load %arg3[%c0, %c0_1, %c0_2] : memref<1x4x512xf32, #tpu.memory_space<vmem>>, vector<1x4x512xf32>
    %4 = vector.shape_cast %3 : vector<1x4x512xf32> to vector<4x512xf32>
    %c0_3 = arith.constant 0 : index
    %c0_4 = arith.constant 0 : index
    %c0_5 = arith.constant 0 : index
    %5 = vector.load %arg4[%c0_3, %c0_4, %c0_5] : memref<1x1x512xi32, #tpu.memory_space<vmem>>, vector<1x1x512xi32>
    %6 = vector.shape_cast %5 : vector<1x1x512xi32> to vector<1x512xi32>
    %7 = tpu.iota {dimensions = array<i32: 0>} : vector<4x512xi32>
    %8 = vector.broadcast %6 : vector<1x512xi32> to vector<4x512xi32>
    %9 = arith.cmpi eq, %7, %8 : vector<4x512xi32>
    %cst = arith.constant 0.000000e+00 : f32
    %10 = vector.broadcast %cst : f32 to vector<4x512xf32>
    %11 = arith.select %9, %4, %10 : vector<4x512xi1>, vector<4x512xf32>
    %cst_6 = arith.constant dense<0.000000e+00> : vector<512xf32>
    %12 = vector.multi_reduction <add>, %11, %cst_6 [0] : vector<4x512xf32> to vector<512xf32>
    %13 = vector.shape_cast %12 : vector<512xf32> to vector<1x512xf32>
    %14 = vector.broadcast %13 : vector<1x512xf32> to vector<4x512xf32>
    %15 = arith.subf %4, %14 : vector<4x512xf32>
    %16 = math.exp %15 : vector<4x512xf32>
    %cst_7 = arith.constant dense<0.000000e+00> : vector<512xf32>
    %17 = vector.multi_reduction <add>, %16, %cst_7 [0] : vector<4x512xf32> to vector<512xf32>
    %18 = vector.shape_cast %17 : vector<512xf32> to vector<1x512xf32>
    %19 = tpu.reciprocal %18 : vector<1x512xf32> -> vector<1x512xf32>
    %20 = tpu.iota {dimensions = array<i32: 1>} : vector<1x512xi32>
    %c2_i32 = arith.constant 2 : i32
    %21 = arith.muli %arg1, %c2_i32 : i32
    %22 = arith.addi %21, %arg2 : i32
    %c512_i32 = arith.constant 512 : i32
    %23 = arith.muli %22, %c512_i32 : i32
    %24 = vector.broadcast %23 : i32 to vector<1x512xi32>
    %25 = arith.addi %24, %20 : vector<1x512xi32>
    %c2048_i32 = arith.constant 2048 : i32
    %26 = vector.broadcast %c2048_i32 : i32 to vector<1x512xi32>
    %27 = arith.cmpi slt, %25, %26 : vector<1x512xi32>
    %cst_8 = arith.constant 0.000000e+00 : f32
    %28 = vector.broadcast %cst_8 : f32 to vector<1x512xf32>
    %29 = arith.select %27, %19, %28 : vector<1x512xi1>, vector<1x512xf32>
    %c0_9 = arith.constant 0 : index
    %c0_10 = arith.constant 0 : index
    %c0_11 = arith.constant 0 : index
    %c0_12 = arith.constant 0 : index
    %30 = vector.load %arg5[%c0_9, %c0_10, %c0_11, %c0_12] : memref<1x1x1x512xf32, #tpu.memory_space<vmem>>, vector<1x1x1x512xf32>
    %31 = vector.shape_cast %29 : vector<1x512xf32> to vector<1x1x1x512xf32>
    %32 = arith.addf %30, %31 : vector<1x1x1x512xf32>
    %c0_13 = arith.constant 0 : index
    %c0_14 = arith.constant 0 : index
    %c0_15 = arith.constant 0 : index
    %c0_16 = arith.constant 0 : index
    %33 = vector.load %arg5[%c0_13, %c0_14, %c0_15, %c0_16] : memref<1x1x1x512xf32, #tpu.memory_space<vmem>>, vector<1x1x1x512xf32>
    tpu.vector_store %arg5[%c0_13, %c0_14, %c0_15, %c0_16], %32 {strides = array<i32>} : memref<1x1x1x512xf32, #tpu.memory_space<vmem>>, vector<1x1x1x512xf32>,
    return
  }
  func.func @transform_0(%arg0: i32, %arg1: i32, %arg2: i32) -> (i32, i32, i32) {
    %c2_i32 = arith.constant 2 : i32
    %0 = arith.muli %arg1, %c2_i32 : i32
    %1 = arith.addi %0, %arg2 : i32
    %c0_i32 = arith.constant 0 : i32
    %c0_i32_0 = arith.constant 0 : i32
    return %arg0, %c0_i32, %1 : i32, i32, i32
  }
  func.func @transform_1(%arg0: i32, %arg1: i32, %arg2: i32) -> (i32, i32, i32) {
    %c2_i32 = arith.constant 2 : i32
    %0 = arith.muli %arg1, %c2_i32 : i32
    %1 = arith.addi %0, %arg2 : i32
    %c0_i32 = arith.constant 0 : i32
    %c0_i32_0 = arith.constant 0 : i32
    return %arg0, %c0_i32, %1 : i32, i32, i32
  }
  func.func @transform_2(%arg0: i32, %arg1: i32, %arg2: i32) -> (i32, i32, i32, i32) {
    %c0_i32 = arith.constant 0 : i32
    %c0_i32_0 = arith.constant 0 : i32
    %c0_i32_1 = arith.constant 0 : i32
    return %arg0, %arg1, %c0_i32, %c0_i32_0 : i32, i32, i32, i32
  }
}

</mosaic_0001>

<bundles_post_ra>
// kernel: tpu_custom_call.1
= control target key start
LH: loop header
LB: loop body
LE: loop exit
PB: predicated region body
PF: predicated region fallthrough
CT: control target
= control target key end

     0   :  { %7 = vsyncpa [#allocation3], 0  ;;  %s1306_s0 = inlined_call_operand.hbm [shape: f32[2,4,2048], index: 0, kind: input, shape index: {}]   ;;  %s1307_s1 = inlined_call_operand.hbm [shape: s32[2,1,2048], index: 1, kind: input, shape index: {}]   ;;  %s1308_s2 = inlined_call_operand.hbm [shape: f32[2,2,1,512], index: 2, kind: output, shape index: {}]  }
   0x1   :  { %9 = vsyncpa [#allocation3 + $0x1], 0 }
   0x2   :  { %10 = vsyncpa [#allocation6], 0 }
   0x3   :  { %12 = vsyncpa [#allocation6 + $0x1], 0 }
   0x4   :  { %13 = vsyncpa [#allocation4], 0 }
   0x5   :  { %15 = vsyncpa [#allocation4 + $0x1], 0  ;;  %s995_s9 = smov 0   ;;  %s997_s10 = smov 0  }
   0x6   :  { %s999_s11 = smov 0   ;;  %s1001_s12 = smov 0  }
   0x7   :  { %s1003_s13 = smov 0   ;;  %s1005_s14 = smov 0  }
   0x8   :  { %s1007_s15 = smov 0   ;;  %s1009_s16 = smov 0  }
   0x9   :  { %s1011_s17 = smov 0   ;;  %s1013_s18 = smov 0  }
   0xa   :  { %s1015_s19 = smov 0   ;;  %s1017_s20 = smov 0  }
   0xb   :  { %s1019_s21 = smov 0  }
   0xc LB: > { %1316 = sst [smem:[#allocation11_spill]] %s949_s14  ;;  %s610_s22 = sadd.s32 4294967295, %s977_s21   ;;  %s977_s21 = sphi %s1019_s21, %s21_s21   ;;  %s973_s20 = sphi %s1017_s20, %s1343_s20   ;;  %s969_s19 = sphi %s1015_s19, %s1342_s19   ;;  %s965_s18 = sphi %s1013_s18, %s1341_s18   ;;  %s961_s17 = sphi %s1011_s17, %s1340_s17   ;;  %s957_s16 = sphi %s1009_s16, %s1339_s16   ;;  %s953_s15 = sphi %s1007_s15, %s1338_s15   ;;  %s949_s14 = sphi %s1005_s14, %s1337_s14   ;;  %s945_s13 = sphi %s1003_s13, %s1348_s13   ;;  %s941_s12 = sphi %s1001_s12, %s1347_s12   ;;  %s937_s11 = sphi %s999_s11, %s1346_s11   ;;  %s933_s10 = sphi %s997_s10, %s1345_s10   ;;  %s929_s9 = sphi %s995_s9, %s1344_s9  }
   0xd   : > { %1317 = sst [smem:[#allocation12_spill]] %s965_s18  ;;  %s33_s24 = sadd.s32 1, %s965_s18 }
   0xe   : > { %1318 = sst [smem:[#allocation13_spill]] %s969_s19  ;;  %s36_s25 = sadd.s32 1, %s969_s19 }
   0xf   : > { %1319 = sst [smem:[#allocation14_spill]] %s973_s20  ;;  %p34_p0 = scmp.ge.s32.totalorder %s33_s24, 2 }
  0x10   : > { %s40_s26 = sadd.s32 1, %s973_s20  ;;  %s612_s27 = sshll.u32 %s969_s19, 1 }
  0x11   : > { %s53_s28 = sadd.s32 1, %s949_s14  ;;  %s1350_s24 = smov (%p34_p0, %s33_s24), 0 }
  0x12   : > { %1320 = sst [smem:[#allocation15_spill]] %s1350_s24  ;;  %s1352_s25 = smov (!%p34_p0, %s36_s25), %s969_s19 }
  0x13   : > { %s1071_s29 = sadd.s32 %s965_s18, %s612_s27  ;;  %p60_p1 = scmp.ne.s32.totalorder %s949_s14, %s945_s13 }
  0x14   : > { %p38_p2 = scmp.ge.s32.totalorder %s1352_s25, 2  ;;  %p61_p3 = scmp.eq.s32.totalorder %s977_s21, 0 }
  0x15   : > { %p66_p4 = scmp.ne.s32.totalorder %s945_s13, %s941_s12  ;;  %p67_p5 = scmp.eq.s32.totalorder %s610_s22, 0 }
  0x16   : > { %s1354_s25 = smov (%p38_p2, %s1352_s25), 0  ;;  %s1356_s26 = smov (!%p38_p2, %s40_s26), %s973_s20 }
  0x17   : > { %1321 = sst [smem:[#allocation16_spill]] %s1354_s25  ;;  %s613_s30 = sshll.u32 %s1354_s25, 1 }
  0x18   : > { %p1084_p6 = por %p61_p3, %p60_p1  ;;  %p42_p7 = scmp.ge.s32.totalorder %s1356_s26, 2 }
  0x19   : > { %s47_s4 = sadd.s32 %s613_s30, %s1350_s24  ;;  %p1090_p8 = por %p67_p5, %p66_p4 }
  0x1a   : > { %s49_s5 = ssub.s32 %s1071_s29, %s47_s4  ;;  %s1358_s26 = smov (%p42_p7, %s1356_s26), 0 }
  0x1b   : > { %1324 = sst [smem:[#allocation17_spill]] %s1358_s26  ;;  %s109_s7 = ssub.s32 %s969_s19, %s1354_s25 }
  0x1c   : > { %s113_s8 = sadd.s32 1, %s937_s11  ;;  %s48_s12 = ssub.s32 %s973_s20, %s1358_s26 }
  0x1d   : > { %p123_p9 = scmp.ne.s32.totalorder %s937_s11, %s933_s10  ;;  %s50_s27 = sor.u32 %s49_s5, %s48_s12 }
  0x1e   : > { %s110_s23 = sor.u32 %s109_s7, %s48_s12  ;;  %p51_p10 = scmp.eq.s32.totalorder %s50_s27, 0 }
  0x1f   : > { %p111_p11 = scmp.eq.s32.totalorder %s110_s23, 0  ;;  %p124_p12 = scmp.eq.s32.totalorder %s610_s22, 7 }
  0x20   : > { %p129_p13 = scmp.ne.s32.totalorder %s933_s10, %s929_s9  ;;  %s1327_s26 = sadd.s32 4294967294, %s977_s21  }
  0x21   : > { %s1108_s30 = scalar_select %p51_p10, %s949_s14, %s53_s28  }
  0x22   : > { %s1111_s4 = scalar_select %p111_p11, %s937_s11, %s113_s8  }
  0x23   : > { %1325 = sst [smem:[#allocation18_spill]] %s1108_s30  ;;  %p1113_p0 = por %p124_p12, %p123_p9 }
  0x24   : > { %p130_p1 = scmp.eq.s32.totalorder %s1327_s26, 7  ;;  %p656_p2 = scmp.lt.s32.totalorder %s977_s21, 8 }
  0x25   : > { %s150_s22 = sand.u32 1, %s949_s14   ;;  %s620_s7 = sshll.u32 %s1071_s29, 2 }
  0x26   : > { %p1120_p3 = por %p130_p1, %p129_p13  ;;  %s618_s23 = sshll.u32 %s150_s22, 4 }
  0x27   : > { %s621_s28 = sshll.u32 %s973_s20, 4  ;;  %s154_s12 = scalar_lea.vmem [#allocation2], %s618_s23 }
  0x28   : > { %s167_s8 = sshll.u32 %s154_s12, 4  ;;  %s161_s27 = sadd.s32 %s621_s28, %s620_s7  ;;  %s168_s8 = int_to_ptr.vmem [resolvable:$true] %s167_s8 }
  0x29   : > { %s622_s24 = sshll.u32 %s161_s27, 2  ;;  %p1129_p4 = pnand %p656_p2, %p1084_p6 }
  0x2a   : > { %s163_s30 = scalar_lea.hbm %s1306_s0, %s622_s24  ;;  %p627_p5 = scmp.ge.s32.totalorder %s977_s21, 1 }
  0x2b   : > { %s165_s14 = sshll.u32 %s163_s30, 4  ;;  %p195_p7 = scmp.lt.s32.totalorder %s977_s21, 9  ;;  %s166_s14 = int_to_ptr.hbm [resolvable:$true] %s165_s14 }
  0x2c   : > { %s151_s29 = scalar_lea.sflag [#allocation3], %s150_s22  ;;  %s623_s23 = sshll.u32 %s150_s22, 2 }
  0x2d   : > { %648 = dma.hbm_to_vmem [thread:$0]  (!%p1129_p4), %s166_s14, 256, %s168_s8, %s151_s29  }
  0x2e   : > { %p196_p9 = pnand %p627_p5, %p195_p7  ;;  %s186_s28 = scalar_lea.hbm %s1307_s1, %s161_s27 }
  0x2f   : > { %s188_s12 = sshll.u32 %s186_s28, 4  ;;  %s178_s20 = scalar_lea.vmem [#allocation5], %s623_s23  ;;  %s189_s12 = int_to_ptr.hbm [resolvable:$true] %s188_s12 }
  0x30   : > { %s190_s18 = sshll.u32 %s178_s20, 4  ;;  %s175_s24 = scalar_lea.sflag [#allocation6], %s150_s22  ;;  %s191_s18 = int_to_ptr.vmem [resolvable:$true] %s190_s18 }
  0x31   : > { %651 = dma.hbm_to_vmem [thread:$0]  (!%p1129_p4), %s189_s12, 64, %s191_s18, %s175_s24  }
  0x32   : > { %199 = sbr.rel (%p196_p9) target bundleno = 159 (0x9f), region = 28  ;;  %s201_s30 = sand.u32 (!%p196_p9), 1, %s945_s13  }
  0x33   : > { %s628_s26 = sshll.u32 (!%p196_p9), %s201_s30, 4  ;;  %s202_s14 = scalar_lea.sflag (!%p196_p9), [#allocation3], %s201_s30 }
  0x34   : > { %s205_s8 = scalar_lea.vmem (!%p196_p9), [#allocation2], %s628_s26 }
  0x37   : > { %916 = dma.done.wait (%p1090_p8), %s202_s14, 256  }
  0x38   : > { %918 = vsyncadd (%p1090_p8), %s202_s14, 4294967040  ;;  %s629_s27 = sshll.u32 %s201_s30, 2  ;;  %s212_s29 = scalar_lea.sflag [#allocation6], %s201_s30 }
  0x39   : > { %s215_s20 = scalar_lea.vmem [#allocation5], %s629_s27 }
  0x3a   : > { %920 = dma.done.wait (%p1090_p8), %s212_s29, 64  }
  0x3b   : > { %922 = vsyncadd (%p1090_p8), %s212_s29, 4294967232  ;;  %s239_s19 = sand.u32 1, %s933_s10   ;;  %p631_p6 = scmp.ne.s32.totalorder %s953_s15, 0 }
  0x3c   : > { %s630_s22 = sshll.u32 %s239_s19, 2 }
  0x3d   : > { %s1157_s23 = scalar_lea.vmem [#allocation7], %s630_s22  ;;  %251 = sbr.rel (%p631_p6) target bundleno = 70 (0x46), region = 40 }
  0x42   : > { %v252_v0 = vlaneseq  ;;  %v979_v1 = vmov 0.0  }
  0x44   : > { %vm254_vm0 = vcmp.lt.s32.totalorder %v252_v0, 512 }
  0x45   : > { %256 = vst.msk [vmem:[%s1157_s23] sm:$0xf] %vm254_vm0, %v979_v1 }
  0x46 PF: > { %v257_v2 = vld [vmem:[%s205_s8] sm:$0xff]  ;;  %v260_v4 = vlaneseq  ;;  %v258_v5 = vld [vmem:[%s205_s8 + $0x8] sm:$0xff]  ;;  %vm287_vm3 = vcmask 1043456   ;;  %s632_s6 = sshll.u32 %s957_s16, 1  ;;  %s636_s28 = sshll.u32 %s961_s17, 3 }
  0x47   : > { %v259_v3 = vld [vmem:[%s215_s20] sm:$0xf]  ;;  %272 = vst [vmem:[#allocation1] ss:$2 sm:$0xff] %v257_v2  ;;  %s435_s3 = sadd.s32 %s953_s15, %s632_s6  ;;  %s635_s15 = sshll.u32 %s957_s16, 2 }
  0x48   : > { %v261_v6 = vshrl.u32 %v260_v4, 7  ;;  %v262_v7 = vperm.slane %v259_v3, 0  ;;  %v263_v8 = vperm.slane %v259_v3, 1  ;;  %274 = vst [vmem:[#allocation1 + $0x10] ss:$2 sm:$0xff] %v258_v5  ;;  %v264_v9 = vperm.slane %v259_v3, 2  ;;  %s483_s16 = sadd.s32 %s636_s28, %s635_s15 }
  0x49   : > { %v265_v10 = vperm.slane %v259_v3, 3  ;;  %s633_s7 = sshll.u32 %s435_s3, 9  ;;  %s484_s18 = scalar_lea.hbm %s1308_s2, %s483_s16 }
  0x4a   : > { %vm266_vm1 = vcmp.eq.s32.totalorder %v261_v6, %v262_v7  ;;  %vm267_vm2 = vcmp.eq.s32.totalorder %v261_v6, %v263_v8  ;;  %vm268_vm4 = vcmp.eq.s32.totalorder %v261_v6, %v264_v9  ;;  %s486_s24 = sshll.u32 %s1157_s23, 4  ;;  %s488_s30 = sshll.u32 %s484_s18, 4  ;;  %s487_s24 = int_to_ptr.vmem [resolvable:$true] %s486_s24  ;;  %s489_s30 = int_to_ptr.hbm [resolvable:$true] %s488_s30 }
  0x4b   : > { %vm269_vm5 = vcmp.eq.s32.totalorder %v261_v6, %v265_v10  ;;  %s472_s26 = scalar_lea.sflag [#allocation4], %s239_s19  ;;  %s849_s14 = sshra.s32 %s489_s30, 4  ;;  %s850_s14 = int_to_ptr.hbm [resolvable:$true] %s849_s14 }
  0x4c   : > { %s851_s8 = scalar_lea.hbm %s850_s14, 4  ;;  %s855_s20 = scalar_lea.hbm %s1308_s2, 16 }
  0x4d   : > { %p852_p8 = scmp.ne.s32.totalorder %s850_s14, %s851_s8  ;;  %p856_p12 = scmp.lt.s32.totalorder %s850_s14, %s1308_s2 }
  0x4e   : > { %v275_v11 = vld.sshfl [vmem:[#allocation1] sm:$0xff pattern:$0x75316420]  ;;  %v276_v12 = vld.sshfl [vmem:[#allocation1 + $0x8] sm:$0xff pattern:$0x75316420]  ;;  %p857_p13 = scmp.lt.s32.totalorder %s855_s20, %s851_s8 }
  0x4f   : > { %v283_v13 = vsel %vm266_vm1, %v275_v11, 0.0  ;;  %v284_v14 = vsel %vm267_vm2, %v276_v12, 0.0  ;;  %v277_v15 = vld.sshfl [vmem:[#allocation1 + $0x10] sm:$0xff pattern:$0x75316420]  ;;  %p853_p10 = pnand %p852_p8, %p1113_p0 }
  0x50   : > { %v288_v16 = vsel %vm287_vm3, %v283_v13, 0.0  ;;  %v295_v17 = vsel %vm287_vm3, %v284_v14, 0.0  ;;  %v278_v18 = vld.sshfl [vmem:[#allocation1 + $0x18] sm:$0xff pattern:$0x75316420]  ;;  %v285_v19 = vsel %vm268_vm4, %v277_v15, 0.0  ;;  %p858_p1 = por %p857_p13, %p856_p12 }
  0x51   : > { %v289_v20 = vrot.slane %v288_v16, 4  ;;  %v296_v21 = vrot.slane %v295_v17, 4  ;;  %v286_v22 = vsel %vm269_vm5, %v278_v18, 0.0  ;;  %v302_v23 = vsel %vm287_vm3, %v285_v19, 0.0  ;;  %p854_p11 = pneg %p853_p10 }
  0x52   : > { %v303_v24 = vrot.slane %v302_v23, 4  ;;  %v309_v25 = vsel %vm287_vm3, %v286_v22, 0.0  ;;  %v430_v18 = vand.u32 127, %v260_v4 }
  0x53   : > { %v290_v26 = vadd.f32 %v289_v20, %v288_v16  ;;  %v297_v27 = vadd.f32 %v296_v21, %v295_v17  ;;  %v310_v28 = vrot.slane %v309_v25, 4  ;;  %p859_p2 = pnand %p858_p1, %p854_p11 }
  0x54   : > { %v304_v29 = vadd.f32 %v303_v24, %v302_v23 }
  0x55   : > { %v291_v30 = vrot.slane %v290_v26, 2  ;;  %v298_v31 = vrot.slane %v297_v27, 2  ;;  %v311_v32 = vadd.f32 %v310_v28, %v309_v25  ;;  %v432_v28 = vadd.s32 256, %v430_v18 }
  0x56   : > { %v305_v33 = vrot.slane %v304_v29, 2 }
  0x57   : > { %v292_v34 = vadd.f32 %v291_v30, %v290_v26  ;;  %v299_v35 = vadd.f32 %v298_v31, %v297_v27  ;;  %v312_v36 = vrot.slane %v311_v32, 2  ;;  %v431_v26 = vadd.s32 128, %v430_v18 }
  0x58   : > { %v306_v37 = vadd.f32 %v305_v33, %v304_v29  ;;  %v437_v29 = vstv %s633_s7  ;;  %v433_v30 = vadd.s32 384, %v430_v18 }
  0x59   : > { %v293_v38 = vrot.slane %v292_v34, 1  ;;  %v300_v39 = vrot.slane %v299_v35, 1  ;;  %v313_v40 = vadd.f32 %v312_v36, %v311_v32  ;;  %v1183_v31 = vadd.s32 %v437_v29, %v431_v26 }
  0x5a   : > { %v307_v42 = vrot.slane %v306_v37, 1  ;;  %v1186_v32 = vadd.s32 %v437_v29, %v432_v28  ;;  %v1188_v36 = vadd.s32 %v437_v29, %v430_v18 }
  0x5b   : > { %v301_v41 = vadd.f32 %v300_v39, %v299_v35  ;;  %v314_v43 = vrot.slane %v313_v40, 1  ;;  %v294_v44 = vadd.f32 %v293_v38, %v292_v34  ;;  %vm443_vm6 = vcmp.lt.s32.totalorder %v1183_v31, 2048 }
  0x5c   : > { %v308_v48 = vadd.f32 %v307_v42, %v306_v37  ;;  %v1190_v37 = vadd.s32 %v437_v29, %v433_v30  ;;  %vm444_vm9 = vcmp.lt.s32.totalorder %v1186_v32, 2048  ;;  %vm442_vm12 = vcmp.lt.s32.totalorder %v1188_v36, 2048 }
  0x5d   : > { %v320_v45 = vrot.slane %v301_v41, 4  ;;  %v315_v46 = vadd.f32 %v314_v43, %v313_v40 }
  0x5e   : > { %vm445_vm13 = vcmp.lt.s32.totalorder %v1190_v37, 2048 }
  0x5f   : > { %v322_v47 = vsel %vm287_vm3, %v294_v44, %v320_v45  ;;  %v321_v49 = vrot.slane %v315_v46, 4 }
  0x60   : > { %v326_v50 = vsub.f32 %v257_v2, %v322_v47 }
  0x61   : > { %v323_v51 = vsel %vm287_vm3, %v308_v48, %v321_v49 }
  0x62   : > { %v328_v52 = vmul.f32 1.442695, %v326_v50  ;;  %v327_v53 = vsub.f32 %v258_v5, %v323_v51 }
  0x64   : > { %763 = vpow2.f32 %v328_v52  ;;  %v330_v54 = vmul.f32 1.442695, %v327_v53 }
  0x66   : > { %765 = vpow2.f32 %v330_v54 }
  0x6a   : > { %v764_v55 = vpop.eup %763 }
  0x6b   : > { %334 = vst [vmem:[#allocation1] ss:$2 sm:$0xff] %v764_v55 }
  0x6c   : > { %v766_v56 = vpop.eup %765 }
  0x6d   : > { %336 = vst [vmem:[#allocation1 + $0x10] ss:$2 sm:$0xff] %v766_v56 }
  0x72   : > { %v338_v57 = vld.sshfl [vmem:[#allocation1 + $0x8] sm:$0xff pattern:$0x75316420]  ;;  %v337_v58 = vld.sshfl [vmem:[#allocation1] sm:$0xff pattern:$0x75316420] }
  0x73   : > { %v345_v59 = vsel %vm287_vm3, %v337_v58, 0.0  ;;  %v352_v60 = vsel %vm287_vm3, %v338_v57, 0.0 }
  0x74   : > { %v339_v61 = vld.sshfl [vmem:[#allocation1 + $0x10] sm:$0xff pattern:$0x75316420]  ;;  %v340_v62 = vld.sshfl [vmem:[#allocation1 + $0x18] sm:$0xff pattern:$0x75316420] }
  0x75   : > { %v346_v63 = vrot.slane %v345_v59, 4  ;;  %v353_v0 = vrot.slane %v352_v60, 4  ;;  %v359_v1 = vsel %vm287_vm3, %v339_v61, 0.0  ;;  %v366_v2 = vsel %vm287_vm3, %v340_v62, 0.0 }
  0x76   : > { %v360_v3 = vrot.slane %v359_v1, 4  ;;  %v367_v5 = vrot.slane %v366_v2, 4 }
  0x77   : > { %v347_v6 = vadd.f32 %v346_v63, %v345_v59  ;;  %v354_v7 = vadd.f32 %v353_v0, %v352_v60 }
  0x78   : > { %v361_v8 = vadd.f32 %v360_v3, %v359_v1  ;;  %v368_v9 = vadd.f32 %v367_v5, %v366_v2 }
  0x79   : > { %v348_v10 = vrot.slane %v347_v6, 2  ;;  %v355_v11 = vrot.slane %v354_v7, 2 }
  0x7a   : > { %v362_v12 = vrot.slane %v361_v8, 2  ;;  %v369_v13 = vrot.slane %v368_v9, 2 }
  0x7b   : > { %v349_v14 = vadd.f32 %v348_v10, %v347_v6  ;;  %v356_v15 = vadd.f32 %v355_v11, %v354_v7 }
  0x7c   : > { %v363_v16 = vadd.f32 %v362_v12, %v361_v8  ;;  %v370_v17 = vadd.f32 %v369_v13, %v368_v9 }
  0x7d   : > { %v350_v19 = vrot.slane %v349_v14, 1  ;;  %v357_v20 = vrot.slane %v356_v15, 1 }
  0x7e   : > { %v364_v21 = vrot.slane %v363_v16, 1  ;;  %v371_v22 = vrot.slane %v370_v17, 1 }
  0x7f   : > { %v351_v23 = vadd.f32 %v350_v19, %v349_v14  ;;  %v1175_v24 = vadd.f32 %v357_v20, %v356_v15 }
  0x80   : > { %v1177_v25 = vadd.f32 %v364_v21, %v363_v16  ;;  %v1179_v27 = vadd.f32 %v371_v22, %v370_v17  ;;  %v450_v22 = vld [vmem:[%s1157_s23] sm:$0xf] }
  0x81   : > { %767 = vrcp.f32 %v351_v23  ;;  %v382_v34 = vand.u32 2147483647, %v351_v23  ;;  %v384_v35 = vand.u32 2147483648, %v351_v23  ;;  %vm378_vm7 = vweird.f32 %v351_v23 }
  0x82   : > { %769 = vrcp.f32 %v1175_v24  ;;  %vm392_vm8 = vweird.f32 %v1175_v24  ;;  %v396_v43 = vand.u32 2147483647, %v1175_v24  ;;  %v398_v44 = vand.u32 2147483648, %v1175_v24 }
  0x83   : > { %771 = vrcp.f32 %v1177_v25  ;;  %vm1199_vm10 = vcmp.eq.f32.partialorder %v382_v34, 8.507059e+37  ;;  %v385_v48 = vor.u32 1.1754944e-38, %v384_v35  ;;  %vm406_vm11 = vweird.f32 %v1177_v25 }
  0x84   : > { %773 = vrcp.f32 %v1179_v27  ;;  %v410_v54 = vand.u32 2147483647, %v1177_v25  ;;  %v412_v55 = vand.u32 2147483648, %v1177_v25  ;;  %v399_v61 = vor.u32 1.1754944e-38, %v398_v44 }
  0x85   : > { %v424_v62 = vand.u32 2147483647, %v1179_v27  ;;  %v426_v63 = vand.u32 2147483648, %v1179_v27  ;;  %vm397_vm5 = vcmp.eq.f32.partialorder %v396_v43, 8.507059e+37 }
  0x86   : > { %v413_v5 = vor.u32 1.1754944e-38, %v412_v55  ;;  %vm411_vm15 = vcmp.eq.f32.partialorder %v410_v54, 8.507059e+37 }
  0x87   : > { %v768_v33 = vpop.eup %767  ;;  %v427_v11 = vor.u32 1.1754944e-38, %v426_v63 }
  0x88   : > { %v770_v38 = vpop.eup %769  ;;  %v374_v39 = vmul.f32 %v768_v33, %v351_v23  ;;  %vm379_vm14 = vweird.f32 %v768_v33 }
  0x89   : > { %v772_v40 = vpop.eup %771  ;;  %v388_v41 = vmul.f32 %v770_v38, %v1175_v24  ;;  %vm393_vm0 = vweird.f32 %v770_v38  ;;  %vm1210_vm2 = vmor %vm378_vm7, %vm379_vm14  ;;  %vm420_vm14 = vweird.f32 %v1179_v27 }
  0x8a   : > { %v375_v42 = vsub.f32 1.0, %v374_v39  ;;  %v402_v45 = vmul.f32 %v772_v40, %v1177_v25  ;;  %v774_v46 = vpop.eup %773  ;;  %vm407_vm1 = vweird.f32 %v772_v40  ;;  %vm394_vm3 = vmor %vm392_vm8, %vm393_vm0 }
  0x8b   : > { %v389_v49 = vsub.f32 1.0, %v388_v41  ;;  %v416_v52 = vmul.f32 %v774_v46, %v1179_v27  ;;  %vm421_vm4 = vweird.f32 %v774_v46  ;;  %vm408_vm7 = vmor %vm406_vm11, %vm407_vm1  ;;  %vm425_vm11 = vcmp.eq.f32.partialorder %v424_v62, 8.507059e+37 }
  0x8c   : > { %v376_v50 = vmul.f32 %v768_v33, %v375_v42  ;;  %v403_v51 = vsub.f32 1.0, %v402_v45  ;;  %vm422_vm8 = vmor %vm420_vm14, %vm421_vm4 }
  0x8d   : > { %v390_v53 = vmul.f32 %v770_v38, %v389_v49  ;;  %v417_v58 = vsub.f32 1.0, %v416_v52 }
  0x8e   : > { %v377_v56 = vadd.f32 %v768_v33, %v376_v50  ;;  %v404_v57 = vmul.f32 %v772_v40, %v403_v51 }
  0x8f   : > { %v391_v60 = vadd.f32 %v770_v38, %v390_v53  ;;  %v418_v2 = vmul.f32 %v774_v46, %v417_v58 }
  0x90   : > { %v381_v0 = vsel %vm1210_vm2, %v768_v33, %v377_v56  ;;  %v405_v1 = vadd.f32 %v772_v40, %v404_v57 }
  0x91   : > { %v395_v3 = vsel %vm394_vm3, %v770_v38, %v391_v60  ;;  %v419_v8 = vadd.f32 %v774_v46, %v418_v2  ;;  %v386_v9 = vsel %vm1199_vm10, %v385_v48, %v381_v0  ;;  %vm1334_vm10 = vcmask 1040384  }
  0x92   : > { %v400_v6 = vsel %vm397_vm5, %v399_v61, %v395_v3  ;;  %v409_v7 = vsel %vm408_vm7, %v772_v40, %v405_v1  ;;  %v446_v18 = vsel %vm442_vm12, %v386_v9, 0.0 }
  0x93   : > { %v414_v10 = vsel %vm411_vm15, %v413_v5, %v409_v7  ;;  %v447_v12 = vsel %vm443_vm6, %v400_v6, 0.0  ;;  %v423_v13 = vsel %vm422_vm8, %v774_v46, %v419_v8  ;;  %vm460_vm6 = vcmask 1042434  }
  0x94   : > { %v448_v14 = vsel %vm444_vm9, %v414_v10, 0.0  ;;  %v455_v15 = vrot.slane %v447_v12, 7  ;;  %v428_v16 = vsel %vm425_vm11, %v427_v11, %v423_v13  ;;  %vm462_vm9 = vcmask 1041408  }
  0x95   : > { %v456_v17 = vrot.slane %v448_v14, 6  ;;  %v449_v19 = vsel %vm445_vm13, %v428_v16, 0.0  ;;  %vm468_vm15 = vcmp.lt.s32.totalorder %v260_v4, 512 }
  0x96   : > { %v457_v20 = vrot.slane %v449_v19, 5  ;;  %v459_v21 = vsel %vm1334_vm10, %v446_v18, %v455_v15 }
  0x98   : > { %v461_v23 = vsel %vm460_vm6, %v456_v17, %v457_v20 }
  0x99   : > { %v463_v24 = vsel %vm462_vm9, %v459_v21, %v461_v23 }
  0x9a   : > { %v465_v25 = vadd.f32 %v463_v24, %v450_v22 }
  0x9c   : > { %470 = vst.msk [vmem:[%s1157_s23] sm:$0xf] %vm468_vm15, %v465_v25 }
  0x9d   : > { %862 = shalt.err (!%p859_p2)
}
  0x9e   : > { %643 = dma.vmem_to_hbm [thread:$0]  (%p1113_p0), %s487_s24, 64, %s489_s30, %s472_s26  }
  0x9f PF: > { %p657_p4 = scmp.ge.s32.totalorder %s977_s21, 2  ;;  %s500_s19 = sand.u32 1, %s929_s9  }
  0xa0   : > { %s501_s23 = scalar_lea.sflag [#allocation4], %s500_s19 }
  0xa1   : > { %p653_p5 = pnand %p657_p4, %p1120_p3 }
  0xa3   : > { %p654_p7 = pneg %p653_p5 }
  0xa5   : > { %924 = dma.done.wait (%p654_p7), %s501_s23, 64  }
  0xa6   : > { %926 = vsyncadd (%p654_p7), %s501_s23, 4294967232  ;;  %s21_s21 = sadd.s32 1, %s977_s21   ;;  %s1336_s25 = sld [smem:[#allocation11_spill]] }
  0xa7   : > { %p1262_p9 = scmp.ge.s32.totalorder %s21_s21, 10   ;;  %s1337_s14 = sld [smem:[#allocation18_spill]] }
  0xa8   : > { %s1338_s15 = sld [smem:[#allocation12_spill]]  ;;  %s1344_s9 = smov %s933_s10 }
  0xa9   : > { %s1339_s16 = sld [smem:[#allocation13_spill]]  ;;  %s1345_s10 = smov %s937_s11 }
  0xaa   : > { %s1340_s17 = sld [smem:[#allocation14_spill]]  ;;  %s1346_s11 = smov %s1111_s4 }
  0xab   : > { %s1341_s18 = sld [smem:[#allocation15_spill]]  ;;  %s1347_s12 = smov %s945_s13 }
  0xac   : > { %s1342_s19 = sld [smem:[#allocation16_spill]]  ;;  %s1348_s13 = smov %s1336_s25 }
  0xad   : > { %s1343_s20 = sld [smem:[#allocation17_spill]]  ;;  %20 = sbr.rel (!%p1262_p9) target bundleno = 12 (0xc), region = 92 }
  0xb2   :  { %507 = vsyncpa [#allocation3], 1 }
  0xb3   :  { %509 = vsyncpa [#allocation3 + $0x1], 1 }
  0xb4   :  { %510 = vsyncpa [#allocation6], 1 }
  0xb5   :  { %512 = vsyncpa [#allocation6 + $0x1], 1 }
  0xb6   :  { %513 = vsyncpa [#allocation4], 1 }
  0xb7   :  { %515 = vsyncpa [#allocation4 + $0x1], 1 }

</bundles_post_ra>
